<compile_context>
chip_gen: v7x
topology: tpu7x:2x2x1
jax: 0.10.0
libtpu: 0.0.40
codegen_flags: <defaults>
</compile_context>

<pallas_src>
import jax
import jax.numpy as jnp
from jax.experimental import pallas as pl
from jax.experimental.pallas import tpu as pltpu


# -----------------------------------------------------------------------------
# Pallas kernel: fused 1x1-conv MLP in channel-major form
#   H1 = lrelu( sum_b W1eff_b @ X_b + t1 )        (c_mid, tile_m)
#   H2 = lrelu( W2eff @ H1 + t2 )                 (c_mid, tile_m)
#   O  = W3 @ H2 + b3                             (c_out, tile_m)
# -----------------------------------------------------------------------------
def _make_combine_kernel(n_branches):
    def kernel(*refs):
        x_refs = refs[:n_branches]
        w1_refs = refs[n_branches:2 * n_branches]
        t1_ref, w2_ref, t2_ref, w3_ref, b3_ref, o_ref = refs[2 * n_branches:]

        # conv1x1 #1 (BN scale folded into W1) + shift + leaky_relu(0.01).
        # Operands are bf16 in the default path; accumulation stays f32.
        h = jnp.dot(w1_refs[0][...], x_refs[0][...],
                    preferred_element_type=jnp.float32)
        for b in range(1, n_branches):
            h = h + jnp.dot(w1_refs[b][...], x_refs[b][...],
                            preferred_element_type=jnp.float32)
        h = h + t1_ref[...]
        h = jnp.where(h >= 0.0, h, 0.01 * h)

        # conv1x1 #2 (BN scale folded into W2) + shift + leaky_relu(0.01)
        h = jnp.dot(w2_ref[...], h.astype(w2_ref.dtype),
                    preferred_element_type=jnp.float32)
        h = h + t2_ref[...]
        h = jnp.where(h >= 0.0, h, 0.01 * h)

        # conv1x1 #3 (with bias)
        out = jnp.dot(w3_ref[...], h.astype(w3_ref.dtype),
                      preferred_element_type=jnp.float32) + b3_ref[...]
        o_ref[...] = out.astype(o_ref.dtype)

    return kernel


def _run_combine_mlp(xs, w1_parts, t1, w2, t2, w3, b3, *, out_dtype,
                     max_tile_m=32768, vmem_limit_bytes=48 * 1024 * 1024):
    """xs: list of (N, nc_b, HW) activations (channel-major, spatial on lanes).

    Returns (N, c_out, HW) in out_dtype.
    """
    nb = len(xs)
    n = xs[0].shape[0]
    hw = xs[0].shape[2]
    c_out = w3.shape[0]

    # Whole H*W slab per image when it fits; otherwise lane-aligned big tiles.
    if hw <= max_tile_m:
        tile_m = hw
        # Keep >= 2 grid steps when N == 1 so v7x's second TensorCore has work
        # (tile must stay a multiple of 128 when it is not the full extent).
        if n == 1 and hw >= 256:
            tile_m = ((pl.cdiv(hw, 2) + 127) // 128) * 128
    else:
        tile_m = max(128, (max_tile_m // 128) * 128)
    num_t = pl.cdiv(hw, tile_m)
    grid = (n, num_t)

    def x_spec(nc):
        return pl.BlockSpec((None, nc, tile_m), lambda ni, ti: (ni, 0, ti))

    def const_spec(shape):
        return pl.BlockSpec(shape, lambda ni, ti: (0, 0))

    in_specs = [x_spec(x.shape[1]) for x in xs]
    in_specs += [const_spec(w.shape) for w in w1_parts]
    in_specs += [const_spec(t1.shape), const_spec(w2.shape),
                 const_spec(t2.shape), const_spec(w3.shape),
                 const_spec(b3.shape)]

    return pl.pallas_call(
        _make_combine_kernel(nb),
        out_shape=jax.ShapeDtypeStruct((n, c_out, hw), out_dtype),
        grid_spec=pltpu.PrefetchScalarGridSpec(
            num_scalar_prefetch=0,
            grid=grid,
            in_specs=in_specs,
            out_specs=pl.BlockSpec((None, c_out, tile_m),
                                   lambda ni, ti: (ni, 0, ti)),
        ),
        compiler_params=pltpu.CompilerParams(
            dimension_semantics=("parallel", "parallel"),
            vmem_limit_bytes=vmem_limit_bytes),
    )(*xs, *w1_parts, t1, w2, t2, w3, b3)


# -----------------------------------------------------------------------------
# Glue: bilinear upsample (align_corners=True) as separable matmuls
# -----------------------------------------------------------------------------
def _interp_matrix(out_size, in_size, dtype=jnp.float32):
    """(out_size, in_size) align_corners=True linear interpolation matrix."""
    if out_size > 1:
        pos = jnp.linspace(0.0, float(in_size - 1), out_size)
    else:
        pos = jnp.zeros((out_size,), jnp.float32)
    lo = jnp.floor(pos).astype(jnp.int32)
    hi = jnp.minimum(lo + 1, in_size - 1)
    w_hi = pos - lo.astype(pos.dtype)
    w_lo = 1.0 - w_hi
    rows = jnp.arange(out_size)
    m = jnp.zeros((out_size, in_size), jnp.float32)
    m = m.at[rows, lo].add(w_lo)
    m = m.at[rows, hi].add(w_hi)
    return m.astype(dtype)


# TODO(synk): the upsample stays in plain-JAX glue (two small interpolation
# matmuls) rather than being fused into the Pallas kernel's spatial tiling.
def _bilinear_upsample_matmul(x, out_h, out_w, dtype):
    """x: (N, C, H, W) -> (N, C, out_h, out_w), align_corners=True bilinear,
    expressed as two small matmuls; runs in `dtype` with f32 accumulation."""
    n, c, h, w = x.shape
    x = x.astype(dtype)
    if h == out_h and w == out_w:
        return x
    ah = _interp_matrix(out_h, h, dtype)                   # (out_h, h)
    aw = _interp_matrix(out_w, w, dtype)                   # (out_w, w)
    y = jnp.einsum("nchw,Hh->ncHw", x, ah,
                   preferred_element_type=jnp.float32)
    y = jnp.einsum("ncHw,Ww->ncHW", y.astype(dtype), aw,
                   preferred_element_type=jnp.float32)
    return y.astype(dtype)


# Gather-based bilinear (reference only).
def _bilinear_align_corners(x, out_h, out_w):
    n, c, h, w = x.shape
    if h == out_h and w == out_w:
        return x
    ys = jnp.linspace(0.0, h - 1.0, out_h) if out_h > 1 else jnp.zeros((out_h,))
    xs = jnp.linspace(0.0, w - 1.0, out_w) if out_w > 1 else jnp.zeros((out_w,))
    y0 = jnp.floor(ys).astype(jnp.int32)
    x0 = jnp.floor(xs).astype(jnp.int32)
    y1 = jnp.minimum(y0 + 1, h - 1)
    x1 = jnp.minimum(x0 + 1, w - 1)
    wy = (ys - y0.astype(ys.dtype))[None, None, :, None]
    wx = (xs - x0.astype(xs.dtype))[None, None, None, :]
    row0 = x[:, :, y0, :]
    row1 = x[:, :, y1, :]
    top = row0[:, :, :, x0] * (1.0 - wx) + row0[:, :, :, x1] * wx
    bot = row1[:, :, :, x0] * (1.0 - wx) + row1[:, :, :, x1] * wx
    return top * (1.0 - wy) + bot * wy


def init_combine_block_params(key, nclasses, num_branches, c_mid=24, eps=1e-5):
    cin = nclasses * num_branches
    ks = jax.random.split(key, 9)
    return {
        # conv weights in PyTorch layout: (out_ch, in_ch)
        "w1": jax.random.normal(ks[0], (c_mid, cin), jnp.float32) * 0.1,
        "w2": jax.random.normal(ks[1], (c_mid, c_mid), jnp.float32) * 0.1,
        "w3": jax.random.normal(ks[2], (nclasses, c_mid), jnp.float32) * 0.1,
        "b3": jax.random.normal(ks[3], (nclasses,), jnp.float32) * 0.1,
        # InPlaceABNSync params (inference mode)
        "bn1_gamma": 1.0 + 0.1 * jax.random.normal(ks[4], (c_mid,), jnp.float32),
        "bn1_beta": 0.1 * jax.random.normal(ks[5], (c_mid,), jnp.float32),
        "bn1_mean": 0.1 * jax.random.normal(ks[6], (c_mid,), jnp.float32),
        "bn1_var": jnp.abs(1.0 + 0.1 * jax.random.normal(ks[7], (c_mid,),
                                                         jnp.float32)),
        "bn2_gamma": 1.0 + 0.1 * jax.random.normal(ks[8], (c_mid,), jnp.float32),
        "bn2_beta": jnp.zeros((c_mid,), jnp.float32),
        "bn2_mean": jnp.zeros((c_mid,), jnp.float32),
        "bn2_var": jnp.ones((c_mid,), jnp.float32),
        "eps": eps,
    }


def combine_block_forward(inputs, params, *, act_dtype=jnp.bfloat16,
                          out_dtype=None, max_tile_m=32768):
    """inputs: list of NCHW float32 arrays. Returns NCHW (N, nclasses, H, W)
    in out_dtype (defaults to act_dtype)."""
    if out_dtype is None:
        out_dtype = act_dtype
    n, _, h, w = inputs[0].shape
    hw = h * w
    branch_sizes = [x.shape[1] for x in inputs]

    # Upsample to the reference resolution in act_dtype (separable matmuls),
    # keep native NCHW, fold spatial dims (free reshape) so spatial lands on
    # the lane axis.
    ups = [_bilinear_upsample_matmul(x, h, w, act_dtype) for x in inputs]
    xs = [u.reshape(n, u.shape[1], hw) for u in ups]

    # Fold BN (running stats) into per-output-channel scale/shift, and the
    # scale into the conv weights (host side, once).
    eps = params["eps"]
    s1 = params["bn1_gamma"] / jnp.sqrt(params["bn1_var"] + eps)
    t1 = (params["bn1_beta"] - params["bn1_mean"] * s1)[:, None]
    s2 = params["bn2_gamma"] / jnp.sqrt(params["bn2_var"] + eps)
    t2 = (params["bn2_beta"] - params["bn2_mean"] * s2)[:, None]

    w1_eff = (params["w1"] * s1[:, None]).astype(act_dtype)   # (c_mid, cin)
    # Split W1 per branch so we never materialize the channel concat in HBM.
    w1_parts = []
    off = 0
    for nc in branch_sizes:
        w1_parts.append(w1_eff[:, off:off + nc])
        off += nc
    w2_eff = (params["w2"] * s2[:, None]).astype(act_dtype)   # (c_mid, c_mid)
    w3 = params["w3"].astype(act_dtype)                       # (c_out, c_mid)
    b3 = params["b3"][:, None].astype(jnp.float32)            # (c_out, 1)

    out = _run_combine_mlp(xs, w1_parts,
                           t1.astype(jnp.float32), w2_eff,
                           t2.astype(jnp.float32), w3, b3,
                           out_dtype=out_dtype, max_tile_m=max_tile_m)
    c_out = params["w3"].shape[0]
    return out.reshape(n, c_out, h, w)


# -----------------------------------------------------------------------------
# Pure-JAX reference (module semantics, f32) for correctness checking
# -----------------------------------------------------------------------------
def _reference_forward(inputs, params):
    n, _, h, w = inputs[0].shape
    ups = [_bilinear_align_corners(x, h, w) for x in inputs]
    x = jnp.concatenate(ups, axis=1)
    eps = params["eps"]

    def bn_lrelu(y, g, b, m, v):
        s = g / jnp.sqrt(v + eps)
        y = y * s[None, :, None, None] + (b - m * s)[None, :, None, None]
        return jnp.where(y >= 0, y, 0.01 * y)

    h1 = jnp.einsum("nchw,oc->nohw", x, params["w1"])
    h1 = bn_lrelu(h1, params["bn1_gamma"], params["bn1_beta"],
                  params["bn1_mean"], params["bn1_var"])
    h2 = jnp.einsum("nchw,oc->nohw", h1, params["w2"])
    h2 = bn_lrelu(h2, params["bn2_gamma"], params["bn2_beta"],
                  params["bn2_mean"], params["bn2_var"])
    o = jnp.einsum("nchw,oc->nohw", h2, params["w3"])
    return o + params["b3"][None, :, None, None]


if __name__ == "__main__":
    key = jax.random.PRNGKey(0)
    nclasses, num_branches = 7, 3          # matches fuse_p = CombineBlock(7, 3)
    n, h, w = 2, 16, 16

    k0, k1, k2, kp = jax.random.split(key, 4)
    # branch 0/1 at full resolution, branch 2 at half resolution (exercises
    # the align_corners=True bilinear upsample path)
    x0 = jax.random.normal(k0, (n, nclasses, h, w), jnp.float32)
    x1 = jax.random.normal(k1, (n, nclasses, h, w), jnp.float32)
    x2 = jax.random.normal(k2, (n, nclasses, h // 2, w // 2), jnp.float32)
    inputs = [x0, x1, x2]

    params = init_combine_block_params(kp, nclasses, num_branches)

    ref = jax.block_until_ready(_reference_forward(inputs, params))

    # Default bf16 operand + output stream (production path; loose tolerance).
    out_bf16 = jax.block_until_ready(combine_block_forward(inputs, params))
    assert out_bf16.shape == (n, nclasses, h, w)
    assert out_bf16.dtype == jnp.bfloat16
    assert jnp.allclose(out_bf16.astype(jnp.float32), ref, atol=5e-2, rtol=5e-2)

    # Exact f32 path for verification.
    out_f32 = jax.block_until_ready(
        combine_block_forward(inputs, params,
                              act_dtype=jnp.float32, out_dtype=jnp.float32))
    assert out_f32.shape == (n, nclasses, h, w)
    assert jnp.allclose(out_f32, ref, atol=1e-3, rtol=1e-3)

    print("KERNEL_OK")
</pallas_src>

<mosaic_0001>
module attributes {stable_mosaic.version = 11 : i64} {
  func.func @kernel(%arg0: i32, %arg1: i32, %arg2: memref<1x7x256xbf16, #tpu.memory_space<vmem>>, %arg3: memref<1x7x256xbf16, #tpu.memory_space<vmem>>, %arg4: memref<1x7x256xbf16, #tpu.memory_space<vmem>>, %arg5: memref<24x7xbf16, #tpu.memory_space<vmem>>, %arg6: memref<24x7xbf16, #tpu.memory_space<vmem>>, %arg7: memref<24x7xbf16, #tpu.memory_space<vmem>>, %arg8: memref<24x1xf32, #tpu.memory_space<vmem>>, %arg9: memref<24x24xbf16, #tpu.memory_space<vmem>>, %arg10: memref<24x1xf32, #tpu.memory_space<vmem>>, %arg11: memref<7x24xbf16, #tpu.memory_space<vmem>>, %arg12: memref<7x1xf32, #tpu.memory_space<vmem>>, %arg13: memref<1x7x256xbf16, #tpu.memory_space<vmem>>) attributes {dimension_semantics = [#tpu.dimension_semantics<parallel>, #tpu.dimension_semantics<parallel>], iteration_bounds = array<i64: 2, 1>, scalar_prefetch = 0 : i64, scratch_operands = 0 : i64, tpu.core_type = #tpu.core_type<tc>, window_params = [{transform_indices = @transform_0, window_bounds = array<i64: 1, 7, 256>}, {transform_indices = @transform_1, window_bounds = array<i64: 1, 7, 256>}, {transform_indices = @transform_2, window_bounds = array<i64: 1, 7, 256>}, {pipeline_mode = #tpu.pipeline_mode<synchronous>, transform_indices = @transform_3, window_bounds = array<i64: 24, 7>}, {pipeline_mode = #tpu.pipeline_mode<synchronous>, transform_indices = @transform_4, window_bounds = array<i64: 24, 7>}, {pipeline_mode = #tpu.pipeline_mode<synchronous>, transform_indices = @transform_5, window_bounds = array<i64: 24, 7>}, {pipeline_mode = #tpu.pipeline_mode<synchronous>, transform_indices = @transform_6, window_bounds = array<i64: 24, 1>}, {pipeline_mode = #tpu.pipeline_mode<synchronous>, transform_indices = @transform_7, window_bounds = array<i64: 24, 24>}, {pipeline_mode = #tpu.pipeline_mode<synchronous>, transform_indices = @transform_8, window_bounds = array<i64: 24, 1>}, {pipeline_mode = #tpu.pipeline_mode<synchronous>, transform_indices = @transform_9, window_bounds = array<i64: 7, 24>}, {pipeline_mode = #tpu.pipeline_mode<synchronous>, transform_indices = @transform_10, window_bounds = array<i64: 7, 1>}, {transform_indices = @transform_11, window_bounds = array<i64: 1, 7, 256>}]} {
    %c0 = arith.constant 0 : index
    %c0_0 = arith.constant 0 : index
    %0 = vector.load %arg5[%c0, %c0_0] : memref<24x7xbf16, #tpu.memory_space<vmem>>, vector<24x7xbf16>
    %c0_1 = arith.constant 0 : index
    %c0_2 = arith.constant 0 : index
    %c0_3 = arith.constant 0 : index
    %1 = vector.load %arg2[%c0_1, %c0_2, %c0_3] : memref<1x7x256xbf16, #tpu.memory_space<vmem>>, vector<1x7x256xbf16>
    %2 = vector.shape_cast %1 : vector<1x7x256xbf16> to vector<7x256xbf16>
    %cst = arith.constant dense<0.000000e+00> : vector<24x256xf32>
    %3 = tpu.matmul %0, %2, %cst {dimension_numbers = #tpu.dot_dimension_numbers<[1], [0], [0], [1], [0, 0, 1, 1], [], []>} : vector<24x7xbf16>, vector<7x256xbf16>, vector<24x256xf32> -> vector<24x256xf32>
    %c0_4 = arith.constant 0 : index
    %c0_5 = arith.constant 0 : index
    %4 = vector.load %arg6[%c0_4, %c0_5] : memref<24x7xbf16, #tpu.memory_space<vmem>>, vector<24x7xbf16>
    %c0_6 = arith.constant 0 : index
    %c0_7 = arith.constant 0 : index
    %c0_8 = arith.constant 0 : index
    %5 = vector.load %arg3[%c0_6, %c0_7, %c0_8] : memref<1x7x256xbf16, #tpu.memory_space<vmem>>, vector<1x7x256xbf16>
    %6 = vector.shape_cast %5 : vector<1x7x256xbf16> to vector<7x256xbf16>
    %cst_9 = arith.constant dense<0.000000e+00> : vector<24x256xf32>
    %7 = tpu.matmul %4, %6, %cst_9 {dimension_numbers = #tpu.dot_dimension_numbers<[1], [0], [0], [1], [0, 0, 1, 1], [], []>} : vector<24x7xbf16>, vector<7x256xbf16>, vector<24x256xf32> -> vector<24x256xf32>
    %8 = arith.addf %3, %7 : vector<24x256xf32>
    %c0_10 = arith.constant 0 : index
    %c0_11 = arith.constant 0 : index
    %9 = vector.load %arg7[%c0_10, %c0_11] : memref<24x7xbf16, #tpu.memory_space<vmem>>, vector<24x7xbf16>
    %c0_12 = arith.constant 0 : index
    %c0_13 = arith.constant 0 : index
    %c0_14 = arith.constant 0 : index
    %10 = vector.load %arg4[%c0_12, %c0_13, %c0_14] : memref<1x7x256xbf16, #tpu.memory_space<vmem>>, vector<1x7x256xbf16>
    %11 = vector.shape_cast %10 : vector<1x7x256xbf16> to vector<7x256xbf16>
    %cst_15 = arith.constant dense<0.000000e+00> : vector<24x256xf32>
    %12 = tpu.matmul %9, %11, %cst_15 {dimension_numbers = #tpu.dot_dimension_numbers<[1], [0], [0], [1], [0, 0, 1, 1], [], []>} : vector<24x7xbf16>, vector<7x256xbf16>, vector<24x256xf32> -> vector<24x256xf32>
    %13 = arith.addf %8, %12 : vector<24x256xf32>
    %c0_16 = arith.constant 0 : index
    %c0_17 = arith.constant 0 : index
    %14 = vector.load %arg8[%c0_16, %c0_17] : memref<24x1xf32, #tpu.memory_space<vmem>>, vector<24x1xf32>
    %15 = vector.broadcast %14 : vector<24x1xf32> to vector<24x256xf32>
    %16 = arith.addf %13, %15 : vector<24x256xf32>
    %cst_18 = arith.constant 0.000000e+00 : f32
    %17 = vector.broadcast %cst_18 : f32 to vector<24x256xf32>
    %18 = arith.cmpf oge, %16, %17 : vector<24x256xf32>
    %cst_19 = arith.constant 0.00999999977 : f32
    %19 = vector.broadcast %cst_19 : f32 to vector<24x256xf32>
    %20 = arith.mulf %19, %16 : vector<24x256xf32>
    %21 = arith.select %18, %16, %20 : vector<24x256xi1>, vector<24x256xf32>
    %c0_20 = arith.constant 0 : index
    %c0_21 = arith.constant 0 : index
    %22 = vector.load %arg9[%c0_20, %c0_21] : memref<24x24xbf16, #tpu.memory_space<vmem>>, vector<24x24xbf16>
    %23 = arith.truncf %21 : vector<24x256xf32> to vector<24x256xbf16>
    %cst_22 = arith.constant dense<0.000000e+00> : vector<24x256xf32>
    %24 = tpu.matmul %22, %23, %cst_22 {dimension_numbers = #tpu.dot_dimension_numbers<[1], [0], [0], [1], [0, 0, 1, 1], [], []>} : vector<24x24xbf16>, vector<24x256xbf16>, vector<24x256xf32> -> vector<24x256xf32>
    %c0_23 = arith.constant 0 : index
    %c0_24 = arith.constant 0 : index
    %25 = vector.load %arg10[%c0_23, %c0_24] : memref<24x1xf32, #tpu.memory_space<vmem>>, vector<24x1xf32>
    %26 = vector.broadcast %25 : vector<24x1xf32> to vector<24x256xf32>
    %27 = arith.addf %24, %26 : vector<24x256xf32>
    %cst_25 = arith.constant 0.000000e+00 : f32
    %28 = vector.broadcast %cst_25 : f32 to vector<24x256xf32>
    %29 = arith.cmpf oge, %27, %28 : vector<24x256xf32>
    %cst_26 = arith.constant 0.00999999977 : f32
    %30 = vector.broadcast %cst_26 : f32 to vector<24x256xf32>
    %31 = arith.mulf %30, %27 : vector<24x256xf32>
    %32 = arith.select %29, %27, %31 : vector<24x256xi1>, vector<24x256xf32>
    %c0_27 = arith.constant 0 : index
    %c0_28 = arith.constant 0 : index
    %33 = vector.load %arg11[%c0_27, %c0_28] : memref<7x24xbf16, #tpu.memory_space<vmem>>, vector<7x24xbf16>
    %34 = arith.truncf %32 : vector<24x256xf32> to vector<24x256xbf16>
    %cst_29 = arith.constant dense<0.000000e+00> : vector<7x256xf32>
    %35 = tpu.matmul %33, %34, %cst_29 {dimension_numbers = #tpu.dot_dimension_numbers<[1], [0], [0], [1], [0, 0, 1, 1], [], []>} : vector<7x24xbf16>, vector<24x256xbf16>, vector<7x256xf32> -> vector<7x256xf32>
    %c0_30 = arith.constant 0 : index
    %c0_31 = arith.constant 0 : index
    %36 = vector.load %arg12[%c0_30, %c0_31] : memref<7x1xf32, #tpu.memory_space<vmem>>, vector<7x1xf32>
    %37 = vector.broadcast %36 : vector<7x1xf32> to vector<7x256xf32>
    %38 = arith.addf %35, %37 : vector<7x256xf32>
    %39 = arith.truncf %38 : vector<7x256xf32> to vector<7x256xbf16>
    %c0_32 = arith.constant 0 : index
    %c0_33 = arith.constant 0 : index
    %c0_34 = arith.constant 0 : index
    %40 = vector.load %arg13[%c0_32, %c0_33, %c0_34] : memref<1x7x256xbf16, #tpu.memory_space<vmem>>, vector<1x7x256xbf16>
    %41 = vector.shape_cast %40 : vector<1x7x256xbf16> to vector<7x256xbf16>
    %42 = vector.shape_cast %39 : vector<7x256xbf16> to vector<1x7x256xbf16>
    tpu.vector_store %arg13[%c0_32, %c0_33, %c0_34], %42 {strides = array<i32>} : memref<1x7x256xbf16, #tpu.memory_space<vmem>>, vector<1x7x256xbf16>,
    return
  }
  func.func @transform_0(%arg0: i32, %arg1: i32) -> (i32, i32, i32) {
    %c0_i32 = arith.constant 0 : i32
    %c0_i32_0 = arith.constant 0 : i32
    return %arg0, %c0_i32, %arg1 : i32, i32, i32
  }
  func.func @transform_1(%arg0: i32, %arg1: i32) -> (i32, i32, i32) {
    %c0_i32 = arith.constant 0 : i32
    %c0_i32_0 = arith.constant 0 : i32
    return %arg0, %c0_i32, %arg1 : i32, i32, i32
  }
  func.func @transform_2(%arg0: i32, %arg1: i32) -> (i32, i32, i32) {
    %c0_i32 = arith.constant 0 : i32
    %c0_i32_0 = arith.constant 0 : i32
    return %arg0, %c0_i32, %arg1 : i32, i32, i32
  }
  func.func @transform_3(%arg0: i32, %arg1: i32) -> (i32, i32) {
    %c0_i32 = arith.constant 0 : i32
    %c0_i32_0 = arith.constant 0 : i32
    %c0_i32_1 = arith.constant 0 : i32
    return %c0_i32, %c0_i32_0 : i32, i32
  }
  func.func @transform_4(%arg0: i32, %arg1: i32) -> (i32, i32) {
    %c0_i32 = arith.constant 0 : i32
    %c0_i32_0 = arith.constant 0 : i32
    %c0_i32_1 = arith.constant 0 : i32
    return %c0_i32, %c0_i32_0 : i32, i32
  }
  func.func @transform_5(%arg0: i32, %arg1: i32) -> (i32, i32) {
    %c0_i32 = arith.constant 0 : i32
    %c0_i32_0 = arith.constant 0 : i32
    %c0_i32_1 = arith.constant 0 : i32
    return %c0_i32, %c0_i32_0 : i32, i32
  }
  func.func @transform_6(%arg0: i32, %arg1: i32) -> (i32, i32) {
    %c0_i32 = arith.constant 0 : i32
    %c0_i32_0 = arith.constant 0 : i32
    %c0_i32_1 = arith.constant 0 : i32
    return %c0_i32, %c0_i32_0 : i32, i32
  }
  func.func @transform_7(%arg0: i32, %arg1: i32) -> (i32, i32) {
    %c0_i32 = arith.constant 0 : i32
    %c0_i32_0 = arith.constant 0 : i32
    %c0_i32_1 = arith.constant 0 : i32
    return %c0_i32, %c0_i32_0 : i32, i32
  }
  func.func @transform_8(%arg0: i32, %arg1: i32) -> (i32, i32) {
    %c0_i32 = arith.constant 0 : i32
    %c0_i32_0 = arith.constant 0 : i32
    %c0_i32_1 = arith.constant 0 : i32
    return %c0_i32, %c0_i32_0 : i32, i32
  }
  func.func @transform_9(%arg0: i32, %arg1: i32) -> (i32, i32) {
    %c0_i32 = arith.constant 0 : i32
    %c0_i32_0 = arith.constant 0 : i32
    %c0_i32_1 = arith.constant 0 : i32
    return %c0_i32, %c0_i32_0 : i32, i32
  }
  func.func @transform_10(%arg0: i32, %arg1: i32) -> (i32, i32) {
    %c0_i32 = arith.constant 0 : i32
    %c0_i32_0 = arith.constant 0 : i32
    %c0_i32_1 = arith.constant 0 : i32
    return %c0_i32, %c0_i32_0 : i32, i32
  }
  func.func @transform_11(%arg0: i32, %arg1: i32) -> (i32, i32, i32) {
    %c0_i32 = arith.constant 0 : i32
    %c0_i32_0 = arith.constant 0 : i32
    return %arg0, %c0_i32, %arg1 : i32, i32, i32
  }
}

</mosaic_0001>

<bundles_post_ra>
// kernel: tpu_custom_call.1
= control target key start
LH: loop header
LB: loop body
LE: loop exit
PB: predicated region body
PF: predicated region fallthrough
CT: control target
= control target key end

     0   :  { %s1291_s17 = smov 0   ;;  %s1293_s18 = smov 0   ;;  %s1410_s0 = inlined_call_operand.vmem [shape: bf16[2,7,256], index: 0, kind: input, shape index: {}]   ;;  %s1411_s1 = inlined_call_operand.vmem [shape: bf16[2,7,256], index: 1, kind: input, shape index: {}]   ;;  %s1412_s2 = inlined_call_operand.vmem [shape: bf16[2,7,256], index: 2, kind: input, shape index: {}]   ;;  %s1413_s3 = inlined_call_operand.vmem [shape: bf16[24,7], index: 3, kind: input, shape index: {}]   ;;  %s1414_s4 = inlined_call_operand.vmem [shape: bf16[24,7], index: 4, kind: input, shape index: {}]   ;;  %s1415_s5 = inlined_call_operand.vmem [shape: bf16[24,7], index: 5, kind: input, shape index: {}]   ;;  %s1416_s6 = inlined_call_operand.vmem [shape: f32[24,1], index: 6, kind: input, shape index: {}]   ;;  %s1417_s7 = inlined_call_operand.vmem [shape: bf16[24,24], index: 7, kind: input, shape index: {}]   ;;  %s1418_s8 = inlined_call_operand.vmem [shape: f32[24,1], index: 8, kind: input, shape index: {}]   ;;  %s1419_s9 = inlined_call_operand.vmem [shape: bf16[7,24], index: 9, kind: input, shape index: {}]   ;;  %s1420_s10 = inlined_call_operand.vmem [shape: f32[7,1], index: 10, kind: input, shape index: {}]   ;;  %s1421_s11 = inlined_call_operand.vmem [shape: bf16[2,7,256], index: 11, kind: output, shape index: {}]  }
   0x1   :  { %s1295_s19 = smov 0  }
   0x2 LB: > { %s33_s20 = sadd.s32 1, %s1223_s18  ;;  %p1113_p0 = scmp.ge.s32.totalorder %s1227_s19, 1  ;;  %s1227_s19 = sphi %s1295_s19, %s21_s19   ;;  %s1223_s18 = sphi %s1293_s18, %s1423_s18   ;;  %s1219_s17 = sphi %s1291_s17, %s1422_s17  }
   0x3   : > { %p35_p1 = scmp.ge.s32.totalorder %s33_s20, 2  ;;  %p392_p2 = scmp.lt.s32.totalorder %s1227_s19, 3 }
   0x5   : > { %s1425_s20 = smov (%p35_p1, %s33_s20), 0  ;;  %p393_p3 = pnand %p1113_p0, %p392_p2 }
   0x6   : > { %p459_p4 = scmp.lt.s32.totalorder (!%p393_p3), %s1219_s17, 1  ;;  %vm527_vm0 = vcmask (!%p393_p3), 1042432   ;;  %v1229_v0 = vmov (!%p393_p3), 0   ;;  %vm528_vm1 = vcmask (!%p393_p3), 1043456   ;;  %v1230_v1 = vmov (!%p393_p3), 65535   ;;  %v750_v11 = vld [vmem:[%s1416_s6] sm:$0xff] (!%p393_p3) }
   0x7   : > { %396 = sbr.rel (%p393_p3) target bundleno = 728 (0x2d8), region = 64  ;;  %569 = vmatprep.mubr.bf16.mxu1 (!%p393_p3), %v1229_v0  ;;  %645 = vmatprep.mubr.bf16.mxu0 (!%p393_p3), %v1229_v0  ;;  %v529_v2 = vsel (!%p393_p3), %vm527_vm0, 4294967295, %v1230_v1  ;;  %v752_v14 = vld [vmem:[%s1416_s6 + $0x10] sm:$0xff] (!%p393_p3)  ;;  %v751_v20 = vld [vmem:[%s1416_s6 + $0x8] sm:$0xff] (!%p393_p3)  ;;  %v1195_v21 = vld [vmem:[%s1414_s4] sm:$0xff] (!%p393_p3)   ;;  %vm520_vm2 = vcmask (!%p393_p3), 56320  }
   0x8   : > { %1189 = vset.pattern.permute.xlu0 (!%p393_p3), %v1229_v0  ;;  %1190 = vset.pattern.permute.xlu1 (!%p393_p3), %v1229_v0  ;;  %v530_v4 = vsel (!%p393_p3), %vm528_vm1, %v529_v2, 0  ;;  %v1196_v22 = vld [vmem:[%s1413_s3] sm:$0xff] (!%p393_p3)   ;;  %v800_v25 = vld [vmem:[%s1418_s8 + $0x8] sm:$0xff] (!%p393_p3)  ;;  %v801_v26 = vld [vmem:[%s1418_s8 + $0x10] sm:$0xff] (!%p393_p3)  ;;  %vm825_vm9 = vcmask (!%p393_p3), 195584  }
   0x9   : > { %755 = vperm.xlu0 (!%p393_p3), %1189, %v750_v11   ;;  %765 = vperm.xlu1 (!%p393_p3), %1190, %v752_v14   ;;  %v799_v23 = vld [vmem:[%s1418_s8] sm:$0xff] (!%p393_p3)  ;;  %v1199_v28 = vld [vmem:[%s1414_s4 + $0x8] ss:$0 sps:$4 sm:$0xff] (!%p393_p3)   ;;  %vm977_vm0 = vsmask.f32 (!%p393_p3), 3328 }
   0xa   : > { %v912_v27 = vld [vmem:[%s1420_s10] sm:$0x7f] (!%p393_p3)  ;;  %v1200_v29 = vld [vmem:[%s1413_s3 + $0x8] ss:$0 sps:$4 sm:$0xff] (!%p393_p3)  }
   0xb   : > { %v1201_v30 = vld [vmem:[%s1415_s5] sm:$0xff] (!%p393_p3)   ;;  %v1202_v31 = vld [vmem:[%s1415_s5 + $0x8] ss:$0 sps:$4 sm:$0xff] (!%p393_p3)  }
   0xd   : > { %760 = vperm.xlu0 (!%p393_p3), %1189, %v751_v20   ;;  %804 = vperm.xlu1 (!%p393_p3), %1190, %v799_v23   ;;  %v1203_v23 = vld [vmem:[%s1417_s7] sm:$0xff] (!%p393_p3)  }
   0xe   : > { %s1427_s17 = smov (!%p459_p4, %s1219_s17), 1 }
   0xf   : > { %s1313_s21 = sshll.u32 %s1427_s17, 3 }
  0x10   : > { %s476_s24 = scalar_lea.vmem %s1411_s1, %s1313_s21  ;;  %s466_s27 = scalar_lea.vmem %s1410_s0, %s1313_s21 }
  0x11   : > { %v506_v3 = vld [vmem:[%s476_s24] sm:$0xff]  ;;  %s486_s30 = scalar_lea.vmem %s1412_s2, %s1313_s21  ;;  %809 = vperm.xlu0 %1189, %v800_v25   ;;  %814 = vperm.xlu1 %1190, %v801_v26   ;;  %s496_s16 = scalar_lea.vmem %s1421_s11, %s1313_s21 }
  0x12   : > { %v502_v5 = vld [vmem:[%s466_s27] sm:$0xff]  ;;  %v1125_v6 = vcombine.high %v506_v3, %v506_v3  ;;  %v1124_v8 = vcombine.low %v506_v3, %v506_v3 }
  0x13   : > { %v1131_v7 = vcombine.high %v502_v5, %v502_v5  ;;  %v1130_v9 = vcombine.low %v502_v5, %v502_v5  ;;  %v667_v10 = vld [vmem:[%s486_s30] sm:$0xff] }
  0x14   : > { %v1136_v12 = vcombine.low %v667_v10, %v667_v10  ;;  %v1137_v13 = vcombine.high %v667_v10, %v667_v10  ;;  %v535_v15 = vand.u32 %v1125_v6, %v530_v4  ;;  %v532_v17 = vand.u32 %v1124_v8, %v530_v4 }
  0x15   : > { %v611_v16 = vand.u32 %v1131_v7, %v530_v4  ;;  %v608_v18 = vand.u32 %v1130_v9, %v530_v4  ;;  %915 = vperm.xlu0 %1189, %v912_v27  }
  0x16   : > { %v691_v19 = vand.u32 %v1137_v13, %v530_v4  ;;  %537 = vmatprep.subr.bf16.mxu1 %v535_v15  ;;  %v688_v24 = vand.u32 %v1136_v12, %v530_v4 }
  0x17   : > { %613 = vmatprep.subr.bf16.mxu0 %v611_v16  ;;  %538 = vmatpush1.bf16.msra.mxu1 %v532_v17 }
  0x18   : > { %614 = vmatpush1.bf16.msra.mxu0 %v608_v18 }
  0x19   : > { %693 = vmatprep.subr.bf16.mxu0 %v691_v19 }
  0x1a   : > { %1126 = vmatmul.mubr.msk.bf16.vlgmr.msra.gmra.mrb[0].mxu1 %vm520_vm2, %v1195_v21 }
  0x1b   : > { %1132 = vmatmul.mubr.msk.bf16.vlgmr.msra.gmra.mrb[0].mxu0 %vm520_vm2, %v1196_v22  ;;  %579 = vmatprep.mubr.bf16.mxu1 %v1229_v0 }
  0x1c   : > { %655 = vmatprep.mubr.bf16.mxu0 %v1229_v0  ;;  %694 = vmatpush1.bf16.msra.mxu0 %v688_v24  ;;  %v1204_v24 = vld [vmem:[%s1417_s7 + $0x8] ss:$0 sps:$4 sm:$0xff]  }
  0x22   : > { %1127 = vmatmul.mubr.msk.bf16.gmra.mrb[4].mxu1 %vm520_vm2, %v1199_v28 }
  0x23   : > { %1133 = vmatmul.mubr.msk.bf16.gmra.mrb[4].mxu0 %vm520_vm2, %v1200_v29  ;;  %870 = vmatprep.mubr.bf16.mxu1 %v1229_v0 }
  0x24   : > { %725 = vmatprep.mubr.bf16.mxu0 %v1229_v0 }
  0x2b   : > { %1138 = vmatmul.mubr.msk.bf16.vlgmr.msra.gmra.mrb[0].mxu0 %vm520_vm2, %v1201_v30 }
  0x2c   : > { %735 = vmatprep.mubr.bf16.mxu0 %v1229_v0 }
  0x33   : > { %1139 = vmatmul.mubr.msk.bf16.gmra.mrb[8].mxu0 %vm520_vm2, %v1202_v31  ;;  %vm979_vm2 = vcmask 1047556  }
  0x88   : > { %v756_v46 = vpop.permute.xlu0 %755  ;;  %v766_v6 = vpop.permute.xlu1 %765 }
  0x8c   : > { %v761_v55 = vpop.permute.xlu0 %760  ;;  %v805_v25 = vpop.permute.xlu1 %804 }
  0x90   : > { %v810_v29 = vpop.permute.xlu0 %809 }
  0xed   : > { %v571_v32 = vpop.f32.mrb[0].mxu1 }
  0xee   : > { %v573_v33 = vpop.f32.mrb[1].mxu1 }
  0xef   : > { %v575_v34 = vpop.f32.mrb[2].mxu1 }
  0xf0   : > { %v577_v35 = vpop.f32.mrb[3].mxu1 }
  0xf5   : > { %v581_v36 = vpop.f32.mrb[4].mxu1 }
  0xf6   : > { %v657_v37 = vpop.f32.mrb[4].mxu0  ;;  %v583_v39 = vpop.f32.mrb[5].mxu1 }
  0xf7   : > { %v658_v38 = vadd.f32 %v657_v37, %v581_v36  ;;  %v659_v40 = vpop.f32.mrb[5].mxu0  ;;  %v585_v43 = vpop.f32.mrb[6].mxu1 }
  0xf8   : > { %v660_v41 = vadd.f32 %v659_v40, %v583_v39  ;;  %v661_v42 = vpop.f32.mrb[6].mxu0  ;;  %v586_v45 = vpop.f32.mrb[7].mxu1 }
  0xf9   : > { %v662_v44 = vpop.f32.mrb[7].mxu0  ;;  %v815_v40 = vpop.permute.xlu1 %814 }
  0xfe   : > { %v727_v47 = vpop.f32.mrb[0].mxu0 }
  0xff   : > { %v1155_v48 = vadd.f32 %v727_v47, %v571_v32  ;;  %v729_v49 = vpop.f32.mrb[1].mxu0 }
 0x100   : > { %v1156_v50 = vadd.f32 %v729_v49, %v573_v33  ;;  %v731_v51 = vpop.f32.mrb[2].mxu0 }
 0x101   : > { %v768_v52 = vadd.f32 %v1155_v48, %v756_v46  ;;  %v1157_v53 = vadd.f32 %v731_v51, %v575_v34  ;;  %v733_v54 = vpop.f32.mrb[3].mxu0 }
 0x102   : > { %v769_v56 = vadd.f32 %v1156_v50, %v756_v46  ;;  %v1158_v57 = vadd.f32 %v733_v54, %v577_v35 }
 0x103   : > { %v780_v58 = vmul.f32 0.01, %v768_v52  ;;  %v770_v59 = vadd.f32 %v1157_v53, %v761_v55  ;;  %vm774_vm3 = vcmp.ge.f32.partialorder %v768_v52, 0.0 }
 0x104   : > { %v781_v60 = vmul.f32 0.01, %v769_v56  ;;  %v771_v61 = vadd.f32 %v1158_v57, %v761_v55  ;;  %vm775_vm4 = vcmp.ge.f32.partialorder %v769_v56, 0.0 }
 0x105   : > { %vm776_vm5 = vcmp.ge.f32.partialorder %v770_v59, 0.0  ;;  %v782_v62 = vmul.f32 0.01, %v770_v59  ;;  %v786_v2 = vsel %vm774_vm3, %v768_v52, %v780_v58  ;;  %v907_v58 = vld [vmem:[%s1419_s9] sm:$0xf] }
 0x106   : > { %vm777_vm6 = vcmp.ge.f32.partialorder %v771_v61, 0.0  ;;  %v783_v63 = vmul.f32 0.01, %v771_v61  ;;  %v737_v1 = vpop.f32.mrb[8].mxu0  ;;  %v787_v9 = vsel %vm775_vm4, %v769_v56, %v781_v60  ;;  %vm980_vm3 = vsmask.f32 7424  ;;  %vm978_vm4 = vmand %vm528_vm1, %vm977_vm0 }
 0x107   : > { %v788_v3 = vsel %vm776_vm5, %v770_v59, %v782_v62  ;;  %v748_v4 = vadd.f32 %v737_v1, %v658_v38  ;;  %v739_v5 = vpop.f32.mrb[9].mxu0  ;;  %v916_v59 = vpop.permute.xlu0 %915  ;;  %vm981_vm5 = vmand %vm979_vm2, %vm980_vm3 }
 0x108   : > { %v749_v7 = vadd.f32 %v739_v5, %v660_v41  ;;  %v741_v8 = vpop.f32.mrb[10].mxu0  ;;  %v789_v10 = vsel %vm777_vm6, %v771_v61, %v783_v63  ;;  %v795_v11 = vpack.c.bf16 %v788_v3, %v786_v2  ;;  %vm982_vm6 = vmor %vm981_vm5, %vm978_vm4  ;;  %v983_v2 = vld [vmem:[%s496_s16] sm:$0xff] }
 0x109   : > { %v772_v12 = vadd.f32 %v766_v6, %v748_v4  ;;  %v742_v13 = vpop.f32.mrb[11].mxu0  ;;  %v796_v14 = vpack.c.bf16 %v789_v10, %v787_v9 }
 0x10a   : > { %v773_v15 = vadd.f32 %v766_v6, %v749_v7 }
 0x10b   : > { %vm778_vm7 = vcmp.ge.f32.partialorder %v772_v12, 0.0  ;;  %v784_v16 = vmul.f32 0.01, %v772_v12  ;;  %838 = vmatprep.subr.bf16.mxu1 %v796_v14 }
 0x10c   : > { %vm779_vm8 = vcmp.ge.f32.partialorder %v773_v15, 0.0  ;;  %v785_v17 = vmul.f32 0.01, %v773_v15  ;;  %839 = vmatpush1.bf16.msra.mxu1 %v795_v11 }
 0x10d   : > { %v790_v18 = vsel %vm778_vm7, %v772_v12, %v784_v16 }
 0x10e   : > { %v791_v19 = vsel %vm779_vm8, %v773_v15, %v785_v17  ;;  %v797_v20 = vpack.c.bf16 %v790_v18, %v790_v18 }
 0x10f   : > { %v798_v21 = vpack.c.bf16 %v791_v19, %v791_v19 }
 0x110   : > { %v833_v22 = vsel %vm528_vm1, %v797_v20, 0 }
 0x111   : > { %1142 = vmatprep.subr.msk.bf16.mxu1 %vm528_vm1, %v798_v21 }
 0x112   : > { %841 = vmatpush1.bf16.msra.mxu1 %v833_v22 }
 0x115   : > { %1143 = vmatmul.mubr.msk.bf16.vlgmr.msra.gmra.mrb[8].mxu1 %vm825_vm9, %v1203_v23 }
 0x116   : > { %880 = vmatprep.mubr.bf16.mxu1 %v1229_v0 }
 0x11d   : > { %1144 = vmatmul.mubr.msk.bf16.gmra.mrb[12].mxu1 %vm825_vm9, %v1204_v24 }
 0x11e   : > { %959 = vmatprep.mubr.bf16.mxu1 %v1229_v0 }
 0x1e8   : > { %v872_v26 = vpop.f32.mrb[8].mxu1 }
 0x1e9   : > { %v873_v27 = vadd.f32 %v872_v26, %v805_v25  ;;  %v874_v28 = vpop.f32.mrb[9].mxu1 }
 0x1ea   : > { %v875_v30 = vadd.f32 %v874_v28, %v805_v25  ;;  %v876_v31 = vpop.f32.mrb[10].mxu1 }
 0x1eb   : > { %v895_v32 = vmul.f32 0.01, %v873_v27  ;;  %v877_v33 = vadd.f32 %v876_v31, %v810_v29  ;;  %v878_v34 = vpop.f32.mrb[11].mxu1  ;;  %vm889_vm10 = vcmp.ge.f32.partialorder %v873_v27, 0.0 }
 0x1ec   : > { %v896_v35 = vmul.f32 0.01, %v875_v30  ;;  %v879_v36 = vadd.f32 %v878_v34, %v810_v29  ;;  %vm890_vm11 = vcmp.ge.f32.partialorder %v875_v30, 0.0 }
 0x1ed   : > { %vm891_vm12 = vcmp.ge.f32.partialorder %v877_v33, 0.0  ;;  %v897_v37 = vmul.f32 0.01, %v877_v33  ;;  %v901_v39 = vsel %vm889_vm10, %v873_v27, %v895_v32 }
 0x1ee   : > { %vm892_vm13 = vcmp.ge.f32.partialorder %v879_v36, 0.0  ;;  %v898_v38 = vmul.f32 0.01, %v879_v36  ;;  %v902_v43 = vsel %vm890_vm11, %v875_v30, %v896_v35 }
 0x1ef   : > { %v903_v0 = vsel %vm891_vm12, %v877_v33, %v897_v37 }
 0x1f0   : > { %v908_v41 = vpack.c.bf16 %v903_v0, %v901_v39  ;;  %v882_v42 = vpop.f32.mrb[12].mxu1  ;;  %v904_v44 = vsel %vm892_vm13, %v879_v36, %v898_v38 }
 0x1f1   : > { %v883_v45 = vadd.f32 %v882_v42, %v815_v40  ;;  %v884_v46 = vpop.f32.mrb[13].mxu1  ;;  %v909_v47 = vpack.c.bf16 %v904_v44, %v902_v43 }
 0x1f2   : > { %v885_v48 = vadd.f32 %v884_v46, %v815_v40  ;;  %v886_v49 = vpop.f32.mrb[14].mxu1 }
 0x1f3   : > { %vm893_vm14 = vcmp.ge.f32.partialorder %v883_v45, 0.0  ;;  %v899_v50 = vmul.f32 0.01, %v883_v45  ;;  %v887_v51 = vpop.f32.mrb[15].mxu1  ;;  %927 = vmatprep.subr.bf16.mxu1 %v909_v47 }
 0x1f4   : > { %vm894_vm15 = vcmp.ge.f32.partialorder %v885_v48, 0.0  ;;  %v900_v52 = vmul.f32 0.01, %v885_v48  ;;  %928 = vmatpush1.bf16.msra.mxu1 %v908_v41 }
 0x1f5   : > { %v905_v53 = vsel %vm893_vm14, %v883_v45, %v899_v50 }
 0x1f6   : > { %v910_v54 = vpack.c.bf16 %v905_v53, %v905_v53  ;;  %v906_v55 = vsel %vm894_vm15, %v885_v48, %v900_v52 }
 0x1f7   : > { %v911_v56 = vpack.c.bf16 %v906_v55, %v906_v55 }
 0x1f8   : > { %v922_v57 = vsel %vm528_vm1, %v910_v54, 0 }
 0x1f9   : > { %1145 = vmatprep.subr.msk.bf16.mxu1 %vm528_vm1, %v911_v56 }
 0x1fa   : > { %930 = vmatpush1.bf16.msra.mxu1 %v922_v57 }
 0x1fd   : > { %1146 = vmatmul.mubr.msk.bf16.vlgmr.msra.gmra.mrb[16].mxu1 %vm825_vm9, %v907_v58 }
 0x2d0   : > { %v961_v60 = vpop.f32.mrb[16].mxu1 }
 0x2d1   : > { %v962_v61 = vadd.f32 %v961_v60, %v916_v59  ;;  %v963_v62 = vpop.f32.mrb[17].mxu1 }
 0x2d2   : > { %v964_v63 = vadd.f32 %v963_v62, %v916_v59  ;;  %v965_v1 = vpop.f32.mrb[18].mxu1 }
 0x2d3   : > { %v966_v3 = vpop.f32.mrb[19].mxu1 }
 0x2d4   : > { %v1154_v4 = vpack.c.bf16 %v964_v63, %v962_v61 }
 0x2d6   : > { %v984_v5 = vsel %vm982_vm6, %v1154_v4, %v983_v2 }
 0x2d7   : > { %985 = vst [vmem:[%s496_s16] sm:$0xff] %v984_v5 }
 0x2d8 PF: > { %s21_s19 = sadd.s32 1, %s1227_s19   ;;  %s1422_s17 = smov %s1223_s18 }
 0x2d9   : > { %p18_p5 = scmp.ge.s32.totalorder %s21_s19, 4   ;;  %s1423_s18 = smov %s1425_s20 }
 0x2db   :  { %20 = sbr.rel (!%p18_p5) target bundleno = 2 (0x2), region = 100 }

</bundles_post_ra>
